<compile_context>
chip_gen: v7x
topology: tpu7x:2x2x1
jax: 0.10.0
libtpu: 0.0.40
codegen_flags: <defaults>
</compile_context>

<pallas_src>
import functools

import jax
import jax.numpy as jnp
from jax.experimental import pallas as pl
from jax.experimental.pallas import tpu as pltpu


_ACC_W = 512                 # fixed lane width of the f32 sum/max scratch
_PAYLOAD_TARGET = 1 << 20    # ~1 MiB HBM payload per grid step
_MAX_TILE = 32 * 1024        # absolute cap on the HW tile (lanes)


def cbam_kernel(x_ref, w1_ref, w2_ref, wsp_ref, o_ref, sum_acc, max_acc,
                *, hw, tile, acc_w, c, g, tail):
    """Grid = (row_blocks, hw_tiles).  x_ref is a (g*C, tile) slab of the
    (N*C, H*W) view of x; sums/maxes are folded into fixed-width f32 scratch."""
    t = pl.program_id(1)
    nt = pl.num_programs(1)

    @pl.when(t == 0)
    def _init():
        sum_acc[...] = jnp.zeros(sum_acc.shape, jnp.float32)
        max_acc[...] = jnp.full(max_acc.shape, -jnp.inf, jnp.float32)

    def accumulate(n_valid):
        # Fold the first n_valid lanes of this tile into the (rows, acc_w)
        # accumulators.  Full chunks accumulate through registers (one scratch
        # read + one write per grid step); the single ragged chunk (if any)
        # does a static-width read-modify-write on the first `rem` lanes.
        full = n_valid // acc_w
        rem = n_valid - full * acc_w
        if full > 0:
            s = sum_acc[...]
            m = max_acc[...]
            for k in range(full):
                chunk = x_ref[:, k * acc_w:(k + 1) * acc_w].astype(jnp.float32)
                s = s + chunk
                m = jnp.maximum(m, chunk)
            sum_acc[...] = s
            max_acc[...] = m
        if rem > 0:
            lo = full * acc_w
            chunk = x_ref[:, lo:lo + rem].astype(jnp.float32)
            sum_acc[:, :rem] = sum_acc[:, :rem] + chunk
            max_acc[:, :rem] = jnp.maximum(max_acc[:, :rem], chunk)

    if tail == tile:
        # Every tile is fully valid: single unmasked steady-state path.
        accumulate(tile)
    else:
        @pl.when(t != nt - 1)
        def _steady():
            accumulate(tile)

        @pl.when(t == nt - 1)
        def _last():
            accumulate(tail)        # `tail` is static -> static slices only

    @pl.when(t == nt - 1)
    def _epilogue():
        # Global avg / max pool over all H*W positions (true hw, not padded).
        avg_p = jnp.sum(sum_acc[...], axis=1, keepdims=True) * (1.0 / hw)  # (rows, 1)
        max_p = jnp.max(max_acc[...], axis=1, keepdims=True)               # (rows, 1)

        w1 = w1_ref[...]     # (C, Cr) == fc1.weight.T
        w2 = w2_ref[...]     # (C, Cr) == fc2.weight
        wsp = wsp_ref[...]   # (1, 2)  7x7-conv centre taps

        def chan_mlp(p):     # p: (C, 1) pooled vector of one image
            h = jnp.sum(w1 * p, axis=0, keepdims=True)       # (1, Cr)  fc1
            h = jnp.maximum(h, 0.0)                          # ReLU
            return jnp.sum(w2 * h, axis=1, keepdims=True)    # (C, 1)   fc2

        # TODO(synk): for real CBAM widths (C >= 128) switch chan_mlp to a single
        # MXU jnp.dot over all g images; at C = 4..64 this VPU path is negligible.
        for gi in range(g):
            pa = avg_p[gi * c:(gi + 1) * c, :]
            pm = max_p[gi * c:(gi + 1) * c, :]
            chan = jax.nn.sigmoid(chan_mlp(pa) + chan_mlp(pm))      # (C, 1)
            # SpatialAttention on a 1x1 map: channel mean/max, centre-tap dot.
            s_avg = jnp.sum(chan, axis=0, keepdims=True) * (1.0 / c)
            s_max = jnp.max(chan, axis=0, keepdims=True)
            o = s_avg * wsp[0:1, 0:1] + s_max * wsp[0:1, 1:2]       # (1, 1)
            o_ref[gi, :, :] = jax.nn.sigmoid(o)


def _pick_images_per_block(n, c):
    # Smallest divisor g of N such that g*C fills the 8-row sublane granule.
    # Smallest -> keeps the most independent row-blocks on the parallel axis.
    for g in range(1, n + 1):
        if n % g == 0 and (g * c) % 8 == 0:
            return g
    return n   # rows == N*C == full leading dim -> always a legal block shape


def _pick_hw_tile(hw, rows, itemsize):
    # ~1 MiB of HBM payload per grid step amortises the ~0.35 us per-step
    # overhead; double-buffered (rows, tile) input + two (rows, 512) f32 scratch
    # buffers stay far below v7x's 32 MiB scoped-VMEM default.
    cap = _PAYLOAD_TARGET // max(rows * itemsize, 1)
    cap = max(_ACC_W, min(_MAX_TILE, (cap // _ACC_W) * _ACC_W))
    return hw if hw <= cap else cap


def cbam_block(x, fc1_w, fc2_w, conv_w):
    """x: (N, C, H, W) NCHW (same convention as the PyTorch module).
    Returns the (N, 1, 1, 1) float32 attention map CbamBlock.forward produces."""
    N, C, H, W = x.shape
    Cr = fc1_w.shape[0]
    HW = H * W
    itemsize = jnp.dtype(x.dtype).itemsize

    g = _pick_images_per_block(N, C)
    rows = g * C
    tile = _pick_hw_tile(HW, rows, itemsize)
    acc_w = min(_ACC_W, tile)
    num_t = (HW + tile - 1) // tile
    tail = HW - (num_t - 1) * tile            # static valid width of the last tile

    x2 = x.reshape(N * C, HW)                                             # free for contiguous NCHW
    w1k = jnp.transpose(fc1_w[:, :, 0, 0]).astype(jnp.float32)            # (C, Cr) = fc1.weight.T
    w2k = fc2_w[:, :, 0, 0].astype(jnp.float32)                           # (C, Cr) = fc2.weight
    kh, kw = conv_w.shape[2], conv_w.shape[3]
    wsp = conv_w[0, :, kh // 2, kw // 2].reshape(1, 2).astype(jnp.float32)  # centre taps

    kernel = functools.partial(cbam_kernel, hw=HW, tile=tile, acc_w=acc_w,
                               c=C, g=g, tail=tail)

    out = pl.pallas_call(
        kernel,
        out_shape=jax.ShapeDtypeStruct((N, 1, 1), jnp.float32),
        grid_spec=pltpu.PrefetchScalarGridSpec(
            num_scalar_prefetch=0,
            grid=(N // g, num_t),
            in_specs=[
                pl.BlockSpec((rows, tile), lambda rb, t: (rb, t)),   # x slab (native dtype)
                pl.BlockSpec((C, Cr), lambda rb, t: (0, 0)),         # fc1.weight.T
                pl.BlockSpec((C, Cr), lambda rb, t: (0, 0)),         # fc2.weight
                pl.BlockSpec((1, 2), lambda rb, t: (0, 0)),          # spatial centre taps
            ],
            out_specs=pl.BlockSpec((g, 1, 1), lambda rb, t: (rb, 0, 0)),
            scratch_shapes=[
                pltpu.VMEM((rows, acc_w), jnp.float32),   # running sum
                pltpu.VMEM((rows, acc_w), jnp.float32),   # running max
            ],
        ),
        compiler_params=pltpu.CompilerParams(
            dimension_semantics=("parallel", "arbitrary"),
            vmem_limit_bytes=32 * 1024 * 1024,            # v7x-safe (64 MiB physical)
        ),
    )(x2, w1k, w2k, wsp)

    return out.reshape(N, 1, 1, 1)


def cbam_ref(x, fc1_w, fc2_w, conv_w):
    """Pure-JAX reference mirroring the PyTorch forward (f32 math)."""
    xf = x.astype(jnp.float32)
    avg_p = jnp.mean(xf, axis=(2, 3))                   # (N, C)
    max_p = jnp.max(xf, axis=(2, 3))                    # (N, C)
    w1 = fc1_w[:, :, 0, 0].astype(jnp.float32)          # (Cr, C)
    w2 = fc2_w[:, :, 0, 0].astype(jnp.float32)          # (C, Cr)

    def mlp(p):
        return jnp.maximum(p @ w1.T, 0.0) @ w2.T

    chan = jax.nn.sigmoid(mlp(avg_p) + mlp(max_p))      # (N, C)
    s = jnp.stack([jnp.mean(chan, axis=-1), jnp.max(chan, axis=-1)], axis=-1)          # (N, 2)
    wc = conv_w[0, :, conv_w.shape[2] // 2, conv_w.shape[3] // 2].astype(jnp.float32)  # (2,)
    return jax.nn.sigmoid(jnp.sum(s * wc, axis=-1)).reshape(x.shape[0], 1, 1, 1)


def _run_case(key, N, C, H, W, ratio, dtype, tol):
    Cr = max(C // ratio, 1)
    kx, k1, k2, k3 = jax.random.split(key, 4)
    x = jax.random.normal(kx, (N, C, H, W), dtype=jnp.float32).astype(dtype)
    fc1_w = jax.random.normal(k1, (Cr, C, 1, 1), dtype=jnp.float32) * 0.5   # fc1: C -> C//ratio
    fc2_w = jax.random.normal(k2, (C, Cr, 1, 1), dtype=jnp.float32) * 0.5   # fc2: C//ratio -> C
    conv_w = jax.random.normal(k3, (1, 2, 7, 7), dtype=jnp.float32) * 0.2   # convl: 2 -> 1, 7x7

    out = jax.block_until_ready(cbam_block(x, fc1_w, fc2_w, conv_w))
    ref = cbam_ref(x, fc1_w, fc2_w, conv_w)
    assert out.shape == (N, 1, 1, 1), out.shape
    assert jnp.allclose(out, ref, atol=tol, rtol=tol), (out, ref)


if __name__ == "__main__":
    key = jax.random.PRNGKey(0)
    k1, k2, k3 = jax.random.split(key, 3)

    # CbamBlock(in_channels=4, ratio=4): f32, 2 images packed per row-block,
    # single HW tile.
    _run_case(k1, N=2, C=4, H=16, W=16, ratio=4, dtype=jnp.float32, tol=1e-5)
    # bf16 input (native-dtype DMA), C=8 keeps 2 parallel row-blocks,
    # single (ragged-chunk) HW tile.
    _run_case(k2, N=2, C=8, H=48, W=48, ratio=4, dtype=jnp.bfloat16, tol=1e-4)
    # Large H*W: exercises multi-tile grid accumulation, the static tail path
    # and the ragged 512-lane fold chunk.
    _run_case(k3, N=2, C=4, H=251, W=250, ratio=4, dtype=jnp.float32, tol=1e-4)

    print("KERNEL_OK")
</pallas_src>

<mosaic_0001>
module attributes {stable_mosaic.version = 11 : i64} {
  func.func @cbam_kernel(%arg0: i32, %arg1: i32, %arg2: memref<8x256xf32, #tpu.memory_space<vmem>>, %arg3: memref<4x1xf32, #tpu.memory_space<vmem>>, %arg4: memref<4x1xf32, #tpu.memory_space<vmem>>, %arg5: memref<1x2xf32, #tpu.memory_space<vmem>>, %arg6: memref<2x1x1xf32, #tpu.memory_space<vmem>>, %arg7: memref<8x256xf32, #tpu.memory_space<vmem>>, %arg8: memref<8x256xf32, #tpu.memory_space<vmem>>) attributes {dimension_semantics = [#tpu.dimension_semantics<parallel>, #tpu.dimension_semantics<arbitrary>], iteration_bounds = array<i64: 1, 1>, scalar_prefetch = 0 : i64, scratch_operands = 2 : i64, tpu.core_type = #tpu.core_type<tc>, window_params = [{transform_indices = @transform_0, window_bounds = array<i64: 8, 256>}, {pipeline_mode = #tpu.pipeline_mode<synchronous>, transform_indices = @transform_1, window_bounds = array<i64: 4, 1>}, {pipeline_mode = #tpu.pipeline_mode<synchronous>, transform_indices = @transform_2, window_bounds = array<i64: 4, 1>}, {pipeline_mode = #tpu.pipeline_mode<synchronous>, transform_indices = @transform_3, window_bounds = array<i64: 1, 2>}, {transform_indices = @transform_4, window_bounds = array<i64: 2, 1, 1>}]} {
    %c0_i32 = arith.constant 0 : i32
    %0 = arith.cmpi eq, %arg1, %c0_i32 : i32
    %1 = arith.extui %0 : i1 to i32
    %c0_i32_0 = arith.constant 0 : i32
    %2 = arith.cmpi ne, %1, %c0_i32_0 : i32
    scf.if %2 {
      %cst = arith.constant 0.000000e+00 : f32
      %13 = vector.broadcast %cst : f32 to vector<8x256xf32>
      %c0_12 = arith.constant 0 : index
      %c0_13 = arith.constant 0 : index
      %14 = vector.load %arg7[%c0_12, %c0_13] : memref<8x256xf32, #tpu.memory_space<vmem>>, vector<8x256xf32>
      tpu.vector_store %arg7[%c0_12, %c0_13], %13 {strides = array<i32>} : memref<8x256xf32, #tpu.memory_space<vmem>>, vector<8x256xf32>,
      %cst_14 = arith.constant 0xFF800000 : f32
      %15 = vector.broadcast %cst_14 : f32 to vector<8x256xf32>
      %c0_15 = arith.constant 0 : index
      %c0_16 = arith.constant 0 : index
      %16 = vector.load %arg8[%c0_15, %c0_16] : memref<8x256xf32, #tpu.memory_space<vmem>>, vector<8x256xf32>
      tpu.vector_store %arg8[%c0_15, %c0_16], %15 {strides = array<i32>} : memref<8x256xf32, #tpu.memory_space<vmem>>, vector<8x256xf32>,
    } else {
    }
    %c0 = arith.constant 0 : index
    %c0_1 = arith.constant 0 : index
    %3 = vector.load %arg7[%c0, %c0_1] : memref<8x256xf32, #tpu.memory_space<vmem>>, vector<8x256xf32>
    %c0_2 = arith.constant 0 : index
    %c0_3 = arith.constant 0 : index
    %4 = vector.load %arg8[%c0_2, %c0_3] : memref<8x256xf32, #tpu.memory_space<vmem>>, vector<8x256xf32>
    %c0_4 = arith.constant 0 : index
    %c0_5 = arith.constant 0 : index
    %5 = vector.load %arg2[%c0_4, %c0_5] : memref<8x256xf32, #tpu.memory_space<vmem>>, vector<8x256xf32>
    %6 = arith.addf %3, %5 : vector<8x256xf32>
    %7 = arith.maximumf %4, %5 : vector<8x256xf32>
    %c0_6 = arith.constant 0 : index
    %c0_7 = arith.constant 0 : index
    %8 = vector.load %arg7[%c0_6, %c0_7] : memref<8x256xf32, #tpu.memory_space<vmem>>, vector<8x256xf32>
    tpu.vector_store %arg7[%c0_6, %c0_7], %6 {strides = array<i32>} : memref<8x256xf32, #tpu.memory_space<vmem>>, vector<8x256xf32>,
    %c0_8 = arith.constant 0 : index
    %c0_9 = arith.constant 0 : index
    %9 = vector.load %arg8[%c0_8, %c0_9] : memref<8x256xf32, #tpu.memory_space<vmem>>, vector<8x256xf32>
    tpu.vector_store %arg8[%c0_8, %c0_9], %7 {strides = array<i32>} : memref<8x256xf32, #tpu.memory_space<vmem>>, vector<8x256xf32>,
    %c0_i32_10 = arith.constant 0 : i32
    %10 = arith.cmpi eq, %arg1, %c0_i32_10 : i32
    %11 = arith.extui %10 : i1 to i32
    %c0_i32_11 = arith.constant 0 : i32
    %12 = arith.cmpi ne, %11, %c0_i32_11 : i32
    scf.if %12 {
      %c0_12 = arith.constant 0 : index
      %c0_13 = arith.constant 0 : index
      %13 = vector.load %arg7[%c0_12, %c0_13] : memref<8x256xf32, #tpu.memory_space<vmem>>, vector<8x256xf32>
      %cst = arith.constant dense<0.000000e+00> : vector<8xf32>
      %14 = vector.multi_reduction <add>, %13, %cst [1] : vector<8x256xf32> to vector<8xf32>
      %15 = vector.shape_cast %14 : vector<8xf32> to vector<8x1xf32>
      %cst_14 = arith.constant 3.906250e-03 : f32
      %16 = vector.broadcast %cst_14 : f32 to vector<8x1xf32>
      %17 = arith.mulf %15, %16 : vector<8x1xf32>
      %c0_15 = arith.constant 0 : index
      %c0_16 = arith.constant 0 : index
      %18 = vector.load %arg8[%c0_15, %c0_16] : memref<8x256xf32, #tpu.memory_space<vmem>>, vector<8x256xf32>
      %cst_17 = arith.constant dense<0xFF800000> : vector<8xf32>
      %19 = vector.multi_reduction <maximumf>, %18, %cst_17 [1] : vector<8x256xf32> to vector<8xf32>
      %20 = vector.shape_cast %19 : vector<8xf32> to vector<8x1xf32>
      %c0_18 = arith.constant 0 : index
      %c0_19 = arith.constant 0 : index
      %21 = vector.load %arg3[%c0_18, %c0_19] : memref<4x1xf32, #tpu.memory_space<vmem>>, vector<4x1xf32>
      %c0_20 = arith.constant 0 : index
      %c0_21 = arith.constant 0 : index
      %22 = vector.load %arg4[%c0_20, %c0_21] : memref<4x1xf32, #tpu.memory_space<vmem>>, vector<4x1xf32>
      %c0_22 = arith.constant 0 : index
      %c0_23 = arith.constant 0 : index
      %23 = vector.load %arg5[%c0_22, %c0_23] : memref<1x2xf32, #tpu.memory_space<vmem>>, vector<1x2xf32>
      %24 = vector.extract_strided_slice %17 {offsets = [0, 0], sizes = [4, 1], strides = [1, 1]} : vector<8x1xf32> to vector<4x1xf32>
      %25 = vector.extract_strided_slice %20 {offsets = [0, 0], sizes = [4, 1], strides = [1, 1]} : vector<8x1xf32> to vector<4x1xf32>
      %26 = arith.mulf %21, %24 : vector<4x1xf32>
      %cst_24 = arith.constant dense<0.000000e+00> : vector<1xf32>
      %27 = vector.multi_reduction <add>, %26, %cst_24 [0] : vector<4x1xf32> to vector<1xf32>
      %28 = vector.shape_cast %27 : vector<1xf32> to vector<1x1xf32>
      %cst_25 = arith.constant 0.000000e+00 : f32
      %29 = vector.broadcast %cst_25 : f32 to vector<1x1xf32>
      %30 = arith.maximumf %28, %29 : vector<1x1xf32>
      %31 = vector.broadcast %30 : vector<1x1xf32> to vector<4x1xf32>
      %32 = arith.mulf %22, %31 : vector<4x1xf32>
      %cst_26 = arith.constant dense<0.000000e+00> : vector<4xf32>
      %33 = vector.multi_reduction <add>, %32, %cst_26 [1] : vector<4x1xf32> to vector<4xf32>
      %34 = vector.shape_cast %33 : vector<4xf32> to vector<4x1xf32>
      %35 = arith.mulf %21, %25 : vector<4x1xf32>
      %cst_27 = arith.constant dense<0.000000e+00> : vector<1xf32>
      %36 = vector.multi_reduction <add>, %35, %cst_27 [0] : vector<4x1xf32> to vector<1xf32>
      %37 = vector.shape_cast %36 : vector<1xf32> to vector<1x1xf32>
      %cst_28 = arith.constant 0.000000e+00 : f32
      %38 = vector.broadcast %cst_28 : f32 to vector<1x1xf32>
      %39 = arith.maximumf %37, %38 : vector<1x1xf32>
      %40 = vector.broadcast %39 : vector<1x1xf32> to vector<4x1xf32>
      %41 = arith.mulf %22, %40 : vector<4x1xf32>
      %cst_29 = arith.constant dense<0.000000e+00> : vector<4xf32>
      %42 = vector.multi_reduction <add>, %41, %cst_29 [1] : vector<4x1xf32> to vector<4xf32>
      %43 = vector.shape_cast %42 : vector<4xf32> to vector<4x1xf32>
      %44 = arith.addf %34, %43 : vector<4x1xf32>
      %45 = arith.negf %44 : vector<4x1xf32>
      %46 = math.exp %45 : vector<4x1xf32>
      %cst_30 = arith.constant 1.000000e+00 : f32
      %47 = vector.broadcast %cst_30 : f32 to vector<4x1xf32>
      %48 = arith.addf %47, %46 : vector<4x1xf32>
      %49 = arith.divf %47, %48 : vector<4x1xf32>
      %cst_31 = arith.constant dense<0.000000e+00> : vector<1xf32>
      %50 = vector.multi_reduction <add>, %49, %cst_31 [0] : vector<4x1xf32> to vector<1xf32>
      %51 = vector.shape_cast %50 : vector<1xf32> to vector<1x1xf32>
      %cst_32 = arith.constant 2.500000e-01 : f32
      %52 = vector.broadcast %cst_32 : f32 to vector<1x1xf32>
      %53 = arith.mulf %51, %52 : vector<1x1xf32>
      %cst_33 = arith.constant dense<0xFF800000> : vector<1xf32>
      %54 = vector.multi_reduction <maximumf>, %49, %cst_33 [0] : vector<4x1xf32> to vector<1xf32>
      %55 = vector.shape_cast %54 : vector<1xf32> to vector<1x1xf32>
      %56 = vector.extract_strided_slice %23 {offsets = [0, 0], sizes = [1, 1], strides = [1, 1]} : vector<1x2xf32> to vector<1x1xf32>
      %57 = arith.mulf %53, %56 : vector<1x1xf32>
      %58 = vector.extract_strided_slice %23 {offsets = [0, 1], sizes = [1, 1], strides = [1, 1]} : vector<1x2xf32> to vector<1x1xf32>
      %59 = arith.mulf %55, %58 : vector<1x1xf32>
      %60 = arith.addf %57, %59 : vector<1x1xf32>
      %61 = arith.negf %60 : vector<1x1xf32>
      %62 = math.exp %61 : vector<1x1xf32>
      %cst_34 = arith.constant 1.000000e+00 : f32
      %63 = vector.broadcast %cst_34 : f32 to vector<1x1xf32>
      %64 = arith.addf %63, %62 : vector<1x1xf32>
      %65 = arith.divf %63, %64 : vector<1x1xf32>
      %c0_35 = arith.constant 0 : index
      %c0_36 = arith.constant 0 : index
      %c0_37 = arith.constant 0 : index
      %66 = vector.load %arg6[%c0_35, %c0_36, %c0_37] : memref<2x1x1xf32, #tpu.memory_space<vmem>>, vector<1x1x1xf32>
      %67 = vector.shape_cast %66 : vector<1x1x1xf32> to vector<1x1xf32>
      %68 = vector.shape_cast %65 : vector<1x1xf32> to vector<1x1x1xf32>
      tpu.vector_store %arg6[%c0_35, %c0_36, %c0_37], %68 {strides = array<i32>} : memref<2x1x1xf32, #tpu.memory_space<vmem>>, vector<1x1x1xf32>,
      %69 = vector.extract_strided_slice %17 {offsets = [4, 0], sizes = [4, 1], strides = [1, 1]} : vector<8x1xf32> to vector<4x1xf32>
      %70 = vector.extract_strided_slice %20 {offsets = [4, 0], sizes = [4, 1], strides = [1, 1]} : vector<8x1xf32> to vector<4x1xf32>
      %71 = arith.mulf %21, %69 : vector<4x1xf32>
      %cst_38 = arith.constant dense<0.000000e+00> : vector<1xf32>
      %72 = vector.multi_reduction <add>, %71, %cst_38 [0] : vector<4x1xf32> to vector<1xf32>
      %73 = vector.shape_cast %72 : vector<1xf32> to vector<1x1xf32>
      %cst_39 = arith.constant 0.000000e+00 : f32
      %74 = vector.broadcast %cst_39 : f32 to vector<1x1xf32>
      %75 = arith.maximumf %73, %74 : vector<1x1xf32>
      %76 = vector.broadcast %75 : vector<1x1xf32> to vector<4x1xf32>
      %77 = arith.mulf %22, %76 : vector<4x1xf32>
      %cst_40 = arith.constant dense<0.000000e+00> : vector<4xf32>
      %78 = vector.multi_reduction <add>, %77, %cst_40 [1] : vector<4x1xf32> to vector<4xf32>
      %79 = vector.shape_cast %78 : vector<4xf32> to vector<4x1xf32>
      %80 = arith.mulf %21, %70 : vector<4x1xf32>
      %cst_41 = arith.constant dense<0.000000e+00> : vector<1xf32>
      %81 = vector.multi_reduction <add>, %80, %cst_41 [0] : vector<4x1xf32> to vector<1xf32>
      %82 = vector.shape_cast %81 : vector<1xf32> to vector<1x1xf32>
      %cst_42 = arith.constant 0.000000e+00 : f32
      %83 = vector.broadcast %cst_42 : f32 to vector<1x1xf32>
      %84 = arith.maximumf %82, %83 : vector<1x1xf32>
      %85 = vector.broadcast %84 : vector<1x1xf32> to vector<4x1xf32>
      %86 = arith.mulf %22, %85 : vector<4x1xf32>
      %cst_43 = arith.constant dense<0.000000e+00> : vector<4xf32>
      %87 = vector.multi_reduction <add>, %86, %cst_43 [1] : vector<4x1xf32> to vector<4xf32>
      %88 = vector.shape_cast %87 : vector<4xf32> to vector<4x1xf32>
      %89 = arith.addf %79, %88 : vector<4x1xf32>
      %90 = arith.negf %89 : vector<4x1xf32>
      %91 = math.exp %90 : vector<4x1xf32>
      %cst_44 = arith.constant 1.000000e+00 : f32
      %92 = vector.broadcast %cst_44 : f32 to vector<4x1xf32>
      %93 = arith.addf %92, %91 : vector<4x1xf32>
      %94 = arith.divf %92, %93 : vector<4x1xf32>
      %cst_45 = arith.constant dense<0.000000e+00> : vector<1xf32>
      %95 = vector.multi_reduction <add>, %94, %cst_45 [0] : vector<4x1xf32> to vector<1xf32>
      %96 = vector.shape_cast %95 : vector<1xf32> to vector<1x1xf32>
      %cst_46 = arith.constant 2.500000e-01 : f32
      %97 = vector.broadcast %cst_46 : f32 to vector<1x1xf32>
      %98 = arith.mulf %96, %97 : vector<1x1xf32>
      %cst_47 = arith.constant dense<0xFF800000> : vector<1xf32>
      %99 = vector.multi_reduction <maximumf>, %94, %cst_47 [0] : vector<4x1xf32> to vector<1xf32>
      %100 = vector.shape_cast %99 : vector<1xf32> to vector<1x1xf32>
      %101 = vector.extract_strided_slice %23 {offsets = [0, 0], sizes = [1, 1], strides = [1, 1]} : vector<1x2xf32> to vector<1x1xf32>
      %102 = arith.mulf %98, %101 : vector<1x1xf32>
      %103 = vector.extract_strided_slice %23 {offsets = [0, 1], sizes = [1, 1], strides = [1, 1]} : vector<1x2xf32> to vector<1x1xf32>
      %104 = arith.mulf %100, %103 : vector<1x1xf32>
      %105 = arith.addf %102, %104 : vector<1x1xf32>
      %106 = arith.negf %105 : vector<1x1xf32>
      %107 = math.exp %106 : vector<1x1xf32>
      %cst_48 = arith.constant 1.000000e+00 : f32
      %108 = vector.broadcast %cst_48 : f32 to vector<1x1xf32>
      %109 = arith.addf %108, %107 : vector<1x1xf32>
      %110 = arith.divf %108, %109 : vector<1x1xf32>
      %c1 = arith.constant 1 : index
      %c0_49 = arith.constant 0 : index
      %c0_50 = arith.constant 0 : index
      %111 = vector.load %arg6[%c1, %c0_49, %c0_50] : memref<2x1x1xf32, #tpu.memory_space<vmem>>, vector<1x1x1xf32>
      %112 = vector.shape_cast %111 : vector<1x1x1xf32> to vector<1x1xf32>
      %113 = vector.shape_cast %110 : vector<1x1xf32> to vector<1x1x1xf32>
      tpu.vector_store %arg6[%c1, %c0_49, %c0_50], %113 {strides = array<i32>} : memref<2x1x1xf32, #tpu.memory_space<vmem>>, vector<1x1x1xf32>,
    } else {
    }
    return
  }
  func.func @transform_0(%arg0: i32, %arg1: i32) -> (i32, i32) {
    %c0_i32 = arith.constant 0 : i32
    return %arg0, %arg1 : i32, i32
  }
  func.func @transform_1(%arg0: i32, %arg1: i32) -> (i32, i32) {
    %c0_i32 = arith.constant 0 : i32
    %c0_i32_0 = arith.constant 0 : i32
    %c0_i32_1 = arith.constant 0 : i32
    return %c0_i32, %c0_i32_0 : i32, i32
  }
  func.func @transform_2(%arg0: i32, %arg1: i32) -> (i32, i32) {
    %c0_i32 = arith.constant 0 : i32
    %c0_i32_0 = arith.constant 0 : i32
    %c0_i32_1 = arith.constant 0 : i32
    return %c0_i32, %c0_i32_0 : i32, i32
  }
  func.func @transform_3(%arg0: i32, %arg1: i32) -> (i32, i32) {
    %c0_i32 = arith.constant 0 : i32
    %c0_i32_0 = arith.constant 0 : i32
    %c0_i32_1 = arith.constant 0 : i32
    return %c0_i32, %c0_i32_0 : i32, i32
  }
  func.func @transform_4(%arg0: i32, %arg1: i32) -> (i32, i32, i32) {
    %c0_i32 = arith.constant 0 : i32
    %c0_i32_0 = arith.constant 0 : i32
    %c0_i32_1 = arith.constant 0 : i32
    return %arg0, %c0_i32, %c0_i32_0 : i32, i32, i32
  }
}

</mosaic_0001>

<bundles_post_ra>
// kernel: tpu_custom_call.1
= control target key start
LH: loop header
LB: loop body
LE: loop exit
PB: predicated region body
PF: predicated region fallthrough
CT: control target
= control target key end

     0   :  { %9 = vsyncpa [#allocation5], 0  ;;  %s245_s15 = smov [#allocation4]   ;;  %s312_s0 = inlined_call_operand.hbm [shape: f32[8,256], index: 0, kind: input, shape index: {}]   ;;  %s313_s1 = inlined_call_operand.vmem [shape: f32[4,1], index: 1, kind: input, shape index: {}]   ;;  %s314_s2 = inlined_call_operand.vmem [shape: f32[4,1], index: 2, kind: input, shape index: {}]   ;;  %s315_s3 = inlined_call_operand.vmem [shape: f32[1,2], index: 3, kind: input, shape index: {}]   ;;  %s316_s4 = inlined_call_operand.vmem [shape: f32[2,1,1], index: 4, kind: output, shape index: {}]  }
   0x1   :  { %s16_s16 = sshll.u32 %s245_s15, 4  ;;  %s221_s19 = scalar_lea.hbm %s312_s0, 256  ;;  %s17_s16 = int_to_ptr.vmem [resolvable:$true] %s16_s16 }
   0x2   :  { %p222_p0 = scmp.ne.s32.totalorder %s312_s0, %s221_s19  ;;  %p225_p1 = scmp.lt.u32.totalorder %s221_s19, %s312_s0 }
   0x4   :  { %p227_p2 = pnand %p225_p1, %p222_p0 }
   0x6   :  { %230 = shalt.err (!%p227_p2)
}
   0x7   :  { %s231_s24 = scalar_lea.vmem %s17_s16, 256  ;;  %p236_p4 = scmp.lt.s32.totalorder %s17_s16, %s17_s16 }
   0x8   :  { %p232_p3 = scmp.ne.s32.totalorder %s17_s16, %s231_s24  ;;  %p237_p5 = scmp.lt.s32.totalorder %s231_s24, %s231_s24 }
   0xa   :  { %p238_p6 = por %p237_p5, %p236_p4 }
   0xc   :  { %p239_p7 = pnand %p238_p6, %p232_p3 }
   0xe   :  { %242 = shalt.err (!%p239_p7)
}
   0xf   :  { %19 = dma.hbm_to_vmem [thread:$0]  %s312_s0, 256, %s17_s16, [#allocation5]  }
  0x10   :  { %243 = dma.done.wait [#allocation5], 256  }
  0x11   :  { %244 = vsyncadd [#allocation5], 4294967040  ;;  %v115_v0 = vlaneseq  ;;  %v41_v3 = vld [vmem:[#allocation4] sm:$0xff]  ;;  %v42_v4 = vld [vmem:[#allocation4 + $0x8] sm:$0xff]  ;;  %s246_s29 = smov 127   ;;  %vm69_vm0 = vcmask 3072  }
  0x12   :  { %v287_v5 = vld [vmem:[%s315_s3] sm:$0x1]  ;;  %v56_v6 = vadd.f32 %v42_v4, %v41_v3  ;;  %v62_v8 = vmax.f32 %v41_v3, %v42_v4  ;;  %vm130_vm1 = vcmask 0  }
  0x13   :  { %v116_v1 = vshrl.u32 %v115_v0, 7  ;;  %v65_v9 = vld [vmem:[%s313_s1] sm:$0xf] }
  0x14   :  { %57 = vadd.xlane.f32.xlu0 %v56_v6  ;;  %v66_v47 = vld [vmem:[%s314_s2] sm:$0xf] }
  0x15   :  { %v117_v2 = vsub.s32 0, %v116_v1 }
  0x17   :  { %v118_v7 = vrot.slane %v287_v5, %v117_v2 }
  0x18   :  { %63 = vmax.xlane.f32.xlu0 %v62_v8 }
  0x19   :  { %119 = vrot.lane.b32.xlu1 %v118_v7, %s246_s29 }
  0xa1   :  { %v58_v10 = vpop.xlane.xlu0 %57 }
  0xa2   :  { %v59_v11 = vmul.f32 0.00390625, %v58_v10 }
  0xa4   :  { %v68_v12 = vmul.f32 %v65_v9, %v59_v11  ;;  %v133_v13 = vrot.slane %v59_v11, 4 }
  0xa5   :  { %v64_v14 = vpop.xlane.xlu0 %63 }
  0xa6   :  { %v70_v15 = vsel %vm69_vm0, %v68_v12, 0.0  ;;  %v135_v16 = vmul.f32 %v133_v13, %v65_v9  ;;  %v80_v17 = vmul.f32 %v65_v9, %v64_v14  ;;  %v147_v18 = vrot.slane %v64_v14, 4 }
  0xa7   :  { %v71_v19 = vrot.slane %v70_v15, 4 }
  0xa8   :  { %v136_v20 = vsel %vm69_vm0, %v135_v16, 0.0  ;;  %v81_v21 = vsel %vm69_vm0, %v80_v17, 0.0  ;;  %v149_v22 = vmul.f32 %v147_v18, %v65_v9 }
  0xa9   :  { %v72_v23 = vadd.f32 %v71_v19, %v70_v15  ;;  %v137_v24 = vrot.slane %v136_v20, 4  ;;  %v82_v25 = vrot.slane %v81_v21, 4 }
  0xaa   :  { %v150_v26 = vsel %vm69_vm0, %v149_v22, 0.0 }
  0xab   :  { %v73_v27 = vrot.slane %v72_v23, 2  ;;  %v138_v28 = vadd.f32 %v137_v24, %v136_v20  ;;  %v83_v29 = vadd.f32 %v82_v25, %v81_v21  ;;  %v151_v30 = vrot.slane %v150_v26, 4 }
  0xad   :  { %v74_v31 = vadd.f32 %v73_v27, %v72_v23  ;;  %v139_v32 = vrot.slane %v138_v28, 2  ;;  %v84_v33 = vrot.slane %v83_v29, 2  ;;  %v152_v34 = vadd.f32 %v151_v30, %v150_v26 }
  0xaf   :  { %v75_v35 = vrot.slane %v74_v31, 1  ;;  %v140_v36 = vadd.f32 %v139_v32, %v138_v28  ;;  %v85_v37 = vadd.f32 %v84_v33, %v83_v29  ;;  %v153_v38 = vrot.slane %v152_v34, 2  ;;  %v120_v29 = vpop.permute.xlu1 %119 }
  0xb1   :  { %v76_v39 = vadd.f32 %v75_v35, %v74_v31  ;;  %v141_v40 = vrot.slane %v140_v36, 1  ;;  %v86_v41 = vrot.slane %v85_v37, 1  ;;  %v154_v42 = vadd.f32 %v153_v38, %v152_v34 }
  0xb3   :  { %v77_v43 = vmax.f32 %v76_v39, 0.0  ;;  %v142_v44 = vadd.f32 %v141_v40, %v140_v36  ;;  %v87_v45 = vadd.f32 %v86_v41, %v85_v37  ;;  %v155_v46 = vrot.slane %v154_v42, 1 }
  0xb5   :  { %v143_v48 = vmax.f32 %v142_v44, 0.0  ;;  %v88_v49 = vmax.f32 %v87_v45, 0.0  ;;  %v156_v50 = vadd.f32 %v155_v46, %v154_v42  ;;  %v78_v51 = vmul.f32 %v77_v43, %v66_v47 }
  0xb7   :  { %v89_v52 = vmul.f32 %v88_v49, %v66_v47  ;;  %v157_v53 = vmax.f32 %v156_v50, 0.0  ;;  %v144_v54 = vmul.f32 %v143_v48, %v66_v47 }
  0xb9   :  { %v91_v55 = vadd.f32 %v89_v52, %v78_v51  ;;  %v158_v56 = vmul.f32 %v157_v53, %v66_v47 }
  0xbb   :  { %v198_v57 = vmul.f32 -1.442695, %v91_v55  ;;  %v160_v58 = vadd.f32 %v158_v56, %v144_v54 }
  0xbd   :  { %205 = vpow2.f32 %v198_v57  ;;  %v200_v59 = vmul.f32 -1.442695, %v160_v58 }
  0xbf   :  { %207 = vpow2.f32 %v200_v59 }
  0xc7   :  { %v206_v60 = vpop.eup %205 }
  0xc8   :  { %v95_v61 = vadd.f32 1.0, %v206_v60 }
  0xc9   :  { %v208_v62 = vpop.eup %207 }
  0xca   :  { %209 = vrcp.f32 %v95_v61  ;;  %v164_v63 = vadd.f32 1.0, %v208_v62 }
  0xcc   :  { %211 = vrcp.f32 %v164_v63 }
  0xd4   :  { %v210_v0 = vpop.eup %209 }
  0xd5   :  { %v98_v1 = vsel %vm69_vm0, %v210_v0, 0.0  ;;  %v106_v2 = vsel %vm69_vm0, %v210_v0, -inf }
  0xd6   :  { %v212_v3 = vpop.eup %211  ;;  %v99_v4 = vrot.slane %v98_v1, 4  ;;  %v107_v6 = vrot.slane %v106_v2, 4 }
  0xd7   :  { %v167_v7 = vsel %vm69_vm0, %v212_v3, 0.0  ;;  %v175_v8 = vsel %vm69_vm0, %v212_v3, -inf }
  0xd8   :  { %v100_v9 = vadd.f32 %v99_v4, %v98_v1  ;;  %v108_v10 = vmax.f32 %v106_v2, %v107_v6  ;;  %v168_v11 = vrot.slane %v167_v7, 4  ;;  %v176_v12 = vrot.slane %v175_v8, 4 }
  0xda   :  { %v101_v13 = vrot.slane %v100_v9, 2  ;;  %v109_v14 = vrot.slane %v108_v10, 2  ;;  %v169_v15 = vadd.f32 %v168_v11, %v167_v7  ;;  %v177_v16 = vmax.f32 %v175_v8, %v176_v12 }
  0xdc   :  { %v102_v17 = vadd.f32 %v101_v13, %v100_v9  ;;  %v110_v18 = vmax.f32 %v108_v10, %v109_v14  ;;  %v170_v19 = vrot.slane %v169_v15, 2  ;;  %v178_v20 = vrot.slane %v177_v16, 2 }
  0xde   :  { %v103_v21 = vrot.slane %v102_v17, 1  ;;  %v111_v22 = vrot.slane %v110_v18, 1  ;;  %v171_v23 = vadd.f32 %v170_v19, %v169_v15  ;;  %v179_v24 = vmax.f32 %v177_v16, %v178_v20 }
  0xe0   :  { %v104_v25 = vadd.f32 %v103_v21, %v102_v17  ;;  %v112_v26 = vmax.f32 %v110_v18, %v111_v22  ;;  %v172_v27 = vrot.slane %v171_v23, 1  ;;  %v180_v28 = vrot.slane %v179_v24, 1 }
  0xe2   :  { %v105_v30 = vmul.f32 0.25, %v104_v25  ;;  %v173_v31 = vadd.f32 %v172_v27, %v171_v23  ;;  %v181_v32 = vmax.f32 %v179_v24, %v180_v28  ;;  %v122_v34 = vmul.f32 %v120_v29, %v112_v26 }
  0xe4   :  { %v113_v33 = vmul.f32 %v105_v30, %v287_v5  ;;  %v174_v35 = vmul.f32 0.25, %v173_v31  ;;  %v183_v38 = vmul.f32 %v181_v32, %v120_v29 }
  0xe6   :  { %v123_v36 = vadd.f32 %v122_v34, %v113_v33  ;;  %v182_v37 = vmul.f32 %v174_v35, %v287_v5 }
  0xe8   :  { %v199_v39 = vmul.f32 -1.442695, %v123_v36  ;;  %v184_v40 = vadd.f32 %v183_v38, %v182_v37 }
  0xea   :  { %213 = vpow2.f32 %v199_v39  ;;  %v201_v41 = vmul.f32 -1.442695, %v184_v40 }
  0xec   :  { %215 = vpow2.f32 %v201_v41 }
  0xf4   :  { %v214_v42 = vpop.eup %213 }
  0xf5   :  { %v127_v43 = vadd.f32 1.0, %v214_v42 }
  0xf6   :  { %v216_v44 = vpop.eup %215 }
  0xf7   :  { %217 = vrcp.f32 %v127_v43  ;;  %v188_v45 = vadd.f32 1.0, %v216_v44 }
  0xf9   :  { %219 = vrcp.f32 %v188_v45 }
 0x101   :  { %v218_v46 = vpop.eup %217 }
 0x102   :  { %131 = vst.msk [vmem:[%s316_s4] sm:$0x1] %vm130_vm1, %v218_v46 }
 0x103   :  { %v220_v47 = vpop.eup %219 }
 0x104   :  { %202 = vst.msk [vmem:[%s316_s4 + $0x1] sm:$0x1] %vm130_vm1, %v220_v47 }
 0x105   :  { %197 = vsyncpa [#allocation5], 1 }

</bundles_post_ra>
